<compile_context>
chip_gen: v5e
topology: v5e:2x2
jax: 0.10.0
libtpu: 0.0.40
codegen_flags: <defaults>
</compile_context>

<pallas_src>
import functools

import jax
import jax.numpy as jnp
from jax.experimental import pallas as pl
from jax.experimental.pallas import tpu as pltpu


def _round_up(x, m):
    return ((x + m - 1) // m) * m


# ----------------------------------------------------------------------------
# Pallas kernels
# ----------------------------------------------------------------------------
def _conv1_stats_kernel(enc_ref, w1_ref, b1_ref, h_ref, stats_ref, *, n_valid, tm):
    """1x1 conv (Cin->C) as VPU MACs + per-tile BN partial stats.

    enc_ref:   (Cin, TM)   geometry features, positions on lanes
    w1_ref:    (C, Cin)
    b1_ref:    (C, 1)
    h_ref:     (C, TM)     conv1 output
    stats_ref: (1, C, 2)   per-tile [sum, sum-of-squares] per channel
    """
    enc = enc_ref[...]                       # (Cin, TM)
    w1 = w1_ref[...]                         # (C, Cin)
    cin = enc.shape[0]

    # Tiny-K contraction on the VPU (avoid feeding the MXU a K=4 matmul).
    acc = w1[:, 0:1] * enc[0:1, :]
    for j in range(1, cin):
        acc = acc + w1[:, j:j + 1] * enc[j:j + 1, :]
    h = acc + b1_ref[...]                    # (C, TM)
    h_ref[...] = h

    # Fused BatchNorm partial statistics (mask out padded columns, if any).
    if n_valid is not None:
        col = pl.program_id(0) * tm + jax.lax.broadcasted_iota(jnp.int32, h.shape, 1)
        hm = jnp.where(col < n_valid, h, 0.0)
    else:
        hm = h
    s = jnp.sum(hm, axis=1, keepdims=True)           # (C, 1)
    ss = jnp.sum(hm * hm, axis=1, keepdims=True)     # (C, 1)
    stats_ref[...] = jnp.concatenate([s, ss], axis=1)[None]   # (1, C, 2)


def _bn_relu_conv2_kernel(h_ref, scale_ref, shift_ref, w2_ref, b2_ref, o_ref):
    """Fused BatchNorm affine + ReLU + 1x1 conv (C->C) on the MXU."""
    y = h_ref[...] * scale_ref[...] + shift_ref[...]      # (C, TM)
    y = jnp.maximum(y, 0.0)
    o_ref[...] = (
        jnp.dot(w2_ref[...], y, preferred_element_type=jnp.float32) + b2_ref[...]
    )


# ----------------------------------------------------------------------------
# GeometryEncoding forward
# ----------------------------------------------------------------------------
def geometry_encoding(params, neighbor_xyz, center_xyz, *,
                      rel=True, use_abs=False, use_euc=True,
                      eps=1e-5, tm=512):
    """neighbor_xyz: (B, 3, N, K); center_xyz: (B, 3, N) -> (B, C, N, K)."""
    b, _, n, k = neighbor_xyz.shape
    c = params["w1"].shape[0]

    # Geometry feature construction (cheap elementwise glue on a 4-channel tensor).
    diff = neighbor_xyz - center_xyz[..., None]
    feats = []
    if rel:
        feats.append(diff)
    if use_abs:
        feats.append(neighbor_xyz)
    if use_euc:
        feats.append(jnp.sqrt(jnp.sum(diff * diff, axis=1, keepdims=True)))
    enc = jnp.concatenate(feats, axis=1)                  # (B, Cin, N, K)
    cin = enc.shape[1]

    # Channels on sublanes, flattened positions on lanes (lane-dense stores).
    m = b * n * k
    enc_cl = jnp.moveaxis(enc, 1, 0).reshape(cin, m)      # (Cin, M)

    tm = min(tm, _round_up(m, 128))                       # keep TM a multiple of 128
    m_pad = _round_up(m, tm)
    if m_pad != m:
        enc_cl = jnp.pad(enc_cl, ((0, 0), (0, m_pad - m)))
    g = m_pad // tm
    n_valid = None if m_pad == m else m

    # --- kernel 1: conv1 (VPU MACs) + fused BN partial stats ------------------
    h, stats = pl.pallas_call(
        functools.partial(_conv1_stats_kernel, n_valid=n_valid, tm=tm),
        out_shape=(jax.ShapeDtypeStruct((c, m_pad), jnp.float32),
                   jax.ShapeDtypeStruct((g, c, 2), jnp.float32)),
        grid=(g,),
        in_specs=[
            pl.BlockSpec((cin, tm), lambda i: (0, i)),
            pl.BlockSpec((c, cin), lambda i: (0, 0)),
            pl.BlockSpec((c, 1), lambda i: (0, 0)),
        ],
        out_specs=(
            pl.BlockSpec((c, tm), lambda i: (0, i)),
            pl.BlockSpec((1, c, 2), lambda i: (i, 0, 0)),
        ),
        compiler_params=pltpu.CompilerParams(dimension_semantics=("parallel",)),
    )(enc_cl, params["w1"], params["b1"].reshape(c, 1))

    # Tiny cross-tile reduction of BN stats + scale/shift (training-mode BN,
    # biased variance, matching PyTorch BatchNorm2d in training).
    total = jnp.sum(stats, axis=0)                        # (C, 2)
    mean = total[:, 0] / m
    var = jnp.maximum(total[:, 1] / m - mean * mean, 0.0)
    scale = params["bn_g"] / jnp.sqrt(var + eps)
    shift = params["bn_b"] - mean * scale

    # --- kernel 2: BN affine + ReLU + conv2 (MXU) ------------------------------
    out = pl.pallas_call(
        _bn_relu_conv2_kernel,
        out_shape=jax.ShapeDtypeStruct((c, m_pad), jnp.float32),
        grid=(g,),
        in_specs=[
            pl.BlockSpec((c, tm), lambda i: (0, i)),
            pl.BlockSpec((c, 1), lambda i: (0, 0)),
            pl.BlockSpec((c, 1), lambda i: (0, 0)),
            pl.BlockSpec((c, c), lambda i: (0, 0)),
            pl.BlockSpec((c, 1), lambda i: (0, 0)),
        ],
        out_specs=pl.BlockSpec((c, tm), lambda i: (0, i)),
        compiler_params=pltpu.CompilerParams(dimension_semantics=("parallel",)),
    )(h, scale.reshape(c, 1), shift.reshape(c, 1),
      params["w2"], params["b2"].reshape(c, 1))

    out = out[:, :m].reshape(c, b, n, k)
    return jnp.moveaxis(out, 0, 1)                        # (B, C, N, K)


# ----------------------------------------------------------------------------
# Pure-JAX reference (for self-validation)
# ----------------------------------------------------------------------------
def geometry_encoding_ref(params, neighbor_xyz, center_xyz, eps=1e-5):
    diff = neighbor_xyz - center_xyz[..., None]
    euc = jnp.sqrt(jnp.sum(diff * diff, axis=1, keepdims=True))
    enc = jnp.concatenate([diff, euc], axis=1)                          # (B, 4, N, K)
    h = jnp.einsum("oc,bcnk->bonk", params["w1"], enc) \
        + params["b1"][None, :, None, None]
    mean = jnp.mean(h, axis=(0, 2, 3))
    var = jnp.mean((h - mean[None, :, None, None]) ** 2, axis=(0, 2, 3))
    hn = (h - mean[None, :, None, None]) / jnp.sqrt(var + eps)[None, :, None, None]
    hn = hn * params["bn_g"][None, :, None, None] + params["bn_b"][None, :, None, None]
    hn = jnp.maximum(hn, 0.0)
    return jnp.einsum("oc,bcnk->bonk", params["w2"], hn) \
        + params["b2"][None, :, None, None]


# ----------------------------------------------------------------------------
# Deterministic parameter init
# ----------------------------------------------------------------------------
def init_params(key, c, cin=4):
    k1, k2, k3, k4 = jax.random.split(key, 4)
    s1 = 1.0 / (cin ** 0.5)
    s2 = 1.0 / (c ** 0.5)
    return dict(
        w1=jax.random.uniform(k1, (c, cin), jnp.float32, minval=-s1, maxval=s1),
        b1=jax.random.uniform(k2, (c,), jnp.float32, minval=-s1, maxval=s1),
        bn_g=jnp.ones((c,), jnp.float32),
        bn_b=jnp.zeros((c,), jnp.float32),
        w2=jax.random.uniform(k3, (c, c), jnp.float32, minval=-s2, maxval=s2),
        b2=jax.random.uniform(k4, (c,), jnp.float32, minval=-s2, maxval=s2),
    )


# ----------------------------------------------------------------------------
if __name__ == "__main__":
    B, N, K, C = 2, 64, 16, 32      # M = B*N*K = 2048 -> 4 grid steps at TM=512

    key = jax.random.PRNGKey(0)
    kc, kn, kp = jax.random.split(key, 3)
    center_xyz = jax.random.uniform(kc, (B, 3, N), jnp.float32, minval=-1.0, maxval=1.0)
    neighbor_xyz = center_xyz[..., None] + 0.1 * jax.random.normal(
        kn, (B, 3, N, K), jnp.float32)

    params = init_params(kp, C, cin=4)

    fwd = jax.jit(functools.partial(geometry_encoding, tm=512))
    out = jax.block_until_ready(fwd(params, neighbor_xyz, center_xyz))

    assert out.shape == (B, C, N, K)
    assert bool(jnp.all(jnp.isfinite(out)))

    ref = geometry_encoding_ref(params, neighbor_xyz, center_xyz)
    max_err = float(jnp.max(jnp.abs(out - ref)))
    assert max_err < 1e-3, f"mismatch vs reference: {max_err}"

    print("KERNEL_OK")
</pallas_src>

<mosaic_0001>
module attributes {stable_mosaic.version = 11 : i64} {
  func.func @_conv1_stats_kernel(%arg0: i32, %arg1: memref<4x512xf32, #tpu.memory_space<vmem>>, %arg2: memref<32x4xf32, #tpu.memory_space<vmem>>, %arg3: memref<32x1xf32, #tpu.memory_space<vmem>>, %arg4: memref<32x512xf32, #tpu.memory_space<vmem>>, %arg5: memref<1x32x2xf32, #tpu.memory_space<vmem>>) attributes {dimension_semantics = [#tpu.dimension_semantics<parallel>], iteration_bounds = array<i64: 4>, scalar_prefetch = 0 : i64, scratch_operands = 0 : i64, tpu.core_type = #tpu.core_type<tc>, window_params = [{transform_indices = @transform_0, window_bounds = array<i64: 4, 512>}, {pipeline_mode = #tpu.pipeline_mode<synchronous>, transform_indices = @transform_1, window_bounds = array<i64: 32, 4>}, {pipeline_mode = #tpu.pipeline_mode<synchronous>, transform_indices = @transform_2, window_bounds = array<i64: 32, 1>}, {transform_indices = @transform_3, window_bounds = array<i64: 32, 512>}, {transform_indices = @transform_4, window_bounds = array<i64: 1, 32, 2>}]} {
    %c0 = arith.constant 0 : index
    %c0_0 = arith.constant 0 : index
    %0 = vector.load %arg1[%c0, %c0_0] : memref<4x512xf32, #tpu.memory_space<vmem>>, vector<4x512xf32>
    %c0_1 = arith.constant 0 : index
    %c0_2 = arith.constant 0 : index
    %1 = vector.load %arg2[%c0_1, %c0_2] : memref<32x4xf32, #tpu.memory_space<vmem>>, vector<32x4xf32>
    %2 = vector.extract_strided_slice %1 {offsets = [0, 0], sizes = [32, 1], strides = [1, 1]} : vector<32x4xf32> to vector<32x1xf32>
    %3 = vector.extract_strided_slice %0 {offsets = [0, 0], sizes = [1, 512], strides = [1, 1]} : vector<4x512xf32> to vector<1x512xf32>
    %4 = vector.broadcast %2 : vector<32x1xf32> to vector<32x512xf32>
    %5 = vector.broadcast %3 : vector<1x512xf32> to vector<32x512xf32>
    %6 = arith.mulf %4, %5 : vector<32x512xf32>
    %7 = vector.extract_strided_slice %1 {offsets = [0, 1], sizes = [32, 1], strides = [1, 1]} : vector<32x4xf32> to vector<32x1xf32>
    %8 = vector.extract_strided_slice %0 {offsets = [1, 0], sizes = [1, 512], strides = [1, 1]} : vector<4x512xf32> to vector<1x512xf32>
    %9 = vector.broadcast %7 : vector<32x1xf32> to vector<32x512xf32>
    %10 = vector.broadcast %8 : vector<1x512xf32> to vector<32x512xf32>
    %11 = arith.mulf %9, %10 : vector<32x512xf32>
    %12 = arith.addf %6, %11 : vector<32x512xf32>
    %13 = vector.extract_strided_slice %1 {offsets = [0, 2], sizes = [32, 1], strides = [1, 1]} : vector<32x4xf32> to vector<32x1xf32>
    %14 = vector.extract_strided_slice %0 {offsets = [2, 0], sizes = [1, 512], strides = [1, 1]} : vector<4x512xf32> to vector<1x512xf32>
    %15 = vector.broadcast %13 : vector<32x1xf32> to vector<32x512xf32>
    %16 = vector.broadcast %14 : vector<1x512xf32> to vector<32x512xf32>
    %17 = arith.mulf %15, %16 : vector<32x512xf32>
    %18 = arith.addf %12, %17 : vector<32x512xf32>
    %19 = vector.extract_strided_slice %1 {offsets = [0, 3], sizes = [32, 1], strides = [1, 1]} : vector<32x4xf32> to vector<32x1xf32>
    %20 = vector.extract_strided_slice %0 {offsets = [3, 0], sizes = [1, 512], strides = [1, 1]} : vector<4x512xf32> to vector<1x512xf32>
    %21 = vector.broadcast %19 : vector<32x1xf32> to vector<32x512xf32>
    %22 = vector.broadcast %20 : vector<1x512xf32> to vector<32x512xf32>
    %23 = arith.mulf %21, %22 : vector<32x512xf32>
    %24 = arith.addf %18, %23 : vector<32x512xf32>
    %c0_3 = arith.constant 0 : index
    %c0_4 = arith.constant 0 : index
    %25 = vector.load %arg3[%c0_3, %c0_4] : memref<32x1xf32, #tpu.memory_space<vmem>>, vector<32x1xf32>
    %26 = vector.broadcast %25 : vector<32x1xf32> to vector<32x512xf32>
    %27 = arith.addf %24, %26 : vector<32x512xf32>
    %c0_5 = arith.constant 0 : index
    %c0_6 = arith.constant 0 : index
    %28 = vector.load %arg4[%c0_5, %c0_6] : memref<32x512xf32, #tpu.memory_space<vmem>>, vector<32x512xf32>
    tpu.vector_store %arg4[%c0_5, %c0_6], %27 {strides = array<i32>} : memref<32x512xf32, #tpu.memory_space<vmem>>, vector<32x512xf32>,
    %cst = arith.constant dense<0.000000e+00> : vector<32xf32>
    %29 = vector.multi_reduction <add>, %27, %cst [1] : vector<32x512xf32> to vector<32xf32>
    %30 = vector.shape_cast %29 : vector<32xf32> to vector<32x1xf32>
    %31 = arith.mulf %27, %27 : vector<32x512xf32>
    %cst_7 = arith.constant dense<0.000000e+00> : vector<32xf32>
    %32 = vector.multi_reduction <add>, %31, %cst_7 [1] : vector<32x512xf32> to vector<32xf32>
    %33 = vector.shape_cast %32 : vector<32xf32> to vector<32x1xf32>
    %34 = tpu.concatenate %30, %33 in 1 : vector<32x1xf32>, vector<32x1xf32> -> vector<32x2xf32>
    %35 = vector.shape_cast %34 : vector<32x2xf32> to vector<1x32x2xf32>
    %c0_8 = arith.constant 0 : index
    %c0_9 = arith.constant 0 : index
    %c0_10 = arith.constant 0 : index
    %36 = vector.load %arg5[%c0_8, %c0_9, %c0_10] : memref<1x32x2xf32, #tpu.memory_space<vmem>>, vector<1x32x2xf32>
    tpu.vector_store %arg5[%c0_8, %c0_9, %c0_10], %35 {strides = array<i32>} : memref<1x32x2xf32, #tpu.memory_space<vmem>>, vector<1x32x2xf32>,
    return
  }
  func.func @transform_0(%arg0: i32) -> (i32, i32) {
    %c0_i32 = arith.constant 0 : i32
    %c0_i32_0 = arith.constant 0 : i32
    return %c0_i32, %arg0 : i32, i32
  }
  func.func @transform_1(%arg0: i32) -> (i32, i32) {
    %c0_i32 = arith.constant 0 : i32
    %c0_i32_0 = arith.constant 0 : i32
    %c0_i32_1 = arith.constant 0 : i32
    return %c0_i32, %c0_i32_0 : i32, i32
  }
  func.func @transform_2(%arg0: i32) -> (i32, i32) {
    %c0_i32 = arith.constant 0 : i32
    %c0_i32_0 = arith.constant 0 : i32
    %c0_i32_1 = arith.constant 0 : i32
    return %c0_i32, %c0_i32_0 : i32, i32
  }
  func.func @transform_3(%arg0: i32) -> (i32, i32) {
    %c0_i32 = arith.constant 0 : i32
    %c0_i32_0 = arith.constant 0 : i32
    return %c0_i32, %arg0 : i32, i32
  }
  func.func @transform_4(%arg0: i32) -> (i32, i32, i32) {
    %c0_i32 = arith.constant 0 : i32
    %c0_i32_0 = arith.constant 0 : i32
    %c0_i32_1 = arith.constant 0 : i32
    return %arg0, %c0_i32, %c0_i32_0 : i32, i32, i32
  }
}

module attributes {stable_mosaic.version = 11 : i64} {
  func.func @_bn_relu_conv2_kernel(%arg0: i32, %arg1: memref<32x512xf32, #tpu.memory_space<vmem>>, %arg2: memref<32x1xf32, #tpu.memory_space<vmem>>, %arg3: memref<32x1xf32, #tpu.memory_space<vmem>>, %arg4: memref<32x32xf32, #tpu.memory_space<vmem>>, %arg5: memref<32x1xf32, #tpu.memory_space<vmem>>, %arg6: memref<32x512xf32, #tpu.memory_space<vmem>>) attributes {dimension_semantics = [#tpu.dimension_semantics<parallel>], iteration_bounds = array<i64: 4>, scalar_prefetch = 0 : i64, scratch_operands = 0 : i64, tpu.core_type = #tpu.core_type<tc>, window_params = [{transform_indices = @transform_0, window_bounds = array<i64: 32, 512>}, {pipeline_mode = #tpu.pipeline_mode<synchronous>, transform_indices = @transform_1, window_bounds = array<i64: 32, 1>}, {pipeline_mode = #tpu.pipeline_mode<synchronous>, transform_indices = @transform_2, window_bounds = array<i64: 32, 1>}, {pipeline_mode = #tpu.pipeline_mode<synchronous>, transform_indices = @transform_3, window_bounds = array<i64: 32, 32>}, {pipeline_mode = #tpu.pipeline_mode<synchronous>, transform_indices = @transform_4, window_bounds = array<i64: 32, 1>}, {transform_indices = @transform_5, window_bounds = array<i64: 32, 512>}]} {
    %c0 = arith.constant 0 : index
    %c0_0 = arith.constant 0 : index
    %0 = vector.load %arg1[%c0, %c0_0] : memref<32x512xf32, #tpu.memory_space<vmem>>, vector<32x512xf32>
    %c0_1 = arith.constant 0 : index
    %c0_2 = arith.constant 0 : index
    %1 = vector.load %arg2[%c0_1, %c0_2] : memref<32x1xf32, #tpu.memory_space<vmem>>, vector<32x1xf32>
    %2 = vector.broadcast %1 : vector<32x1xf32> to vector<32x512xf32>
    %3 = arith.mulf %0, %2 : vector<32x512xf32>
    %c0_3 = arith.constant 0 : index
    %c0_4 = arith.constant 0 : index
    %4 = vector.load %arg3[%c0_3, %c0_4] : memref<32x1xf32, #tpu.memory_space<vmem>>, vector<32x1xf32>
    %5 = vector.broadcast %4 : vector<32x1xf32> to vector<32x512xf32>
    %6 = arith.addf %3, %5 : vector<32x512xf32>
    %cst = arith.constant 0.000000e+00 : f32
    %7 = vector.broadcast %cst : f32 to vector<32x512xf32>
    %8 = arith.maximumf %6, %7 : vector<32x512xf32>
    %c0_5 = arith.constant 0 : index
    %c0_6 = arith.constant 0 : index
    %9 = vector.load %arg4[%c0_5, %c0_6] : memref<32x32xf32, #tpu.memory_space<vmem>>, vector<32x32xf32>
    %cst_7 = arith.constant dense<0.000000e+00> : vector<32x512xf32>
    %10 = tpu.matmul %9, %8, %cst_7 {dimension_numbers = #tpu.dot_dimension_numbers<[1], [0], [0], [1], [0, 0, 1, 1], [], []>} : vector<32x32xf32>, vector<32x512xf32>, vector<32x512xf32> -> vector<32x512xf32>
    %c0_8 = arith.constant 0 : index
    %c0_9 = arith.constant 0 : index
    %11 = vector.load %arg5[%c0_8, %c0_9] : memref<32x1xf32, #tpu.memory_space<vmem>>, vector<32x1xf32>
    %12 = vector.broadcast %11 : vector<32x1xf32> to vector<32x512xf32>
    %13 = arith.addf %10, %12 : vector<32x512xf32>
    %c0_10 = arith.constant 0 : index
    %c0_11 = arith.constant 0 : index
    %14 = vector.load %arg6[%c0_10, %c0_11] : memref<32x512xf32, #tpu.memory_space<vmem>>, vector<32x512xf32>
    tpu.vector_store %arg6[%c0_10, %c0_11], %13 {strides = array<i32>} : memref<32x512xf32, #tpu.memory_space<vmem>>, vector<32x512xf32>,
    return
  }
  func.func @transform_0(%arg0: i32) -> (i32, i32) {
    %c0_i32 = arith.constant 0 : i32
    %c0_i32_0 = arith.constant 0 : i32
    return %c0_i32, %arg0 : i32, i32
  }
  func.func @transform_1(%arg0: i32) -> (i32, i32) {
    %c0_i32 = arith.constant 0 : i32
    %c0_i32_0 = arith.constant 0 : i32
    %c0_i32_1 = arith.constant 0 : i32
    return %c0_i32, %c0_i32_0 : i32, i32
  }
  func.func @transform_2(%arg0: i32) -> (i32, i32) {
    %c0_i32 = arith.constant 0 : i32
    %c0_i32_0 = arith.constant 0 : i32
    %c0_i32_1 = arith.constant 0 : i32
    return %c0_i32, %c0_i32_0 : i32, i32
  }
  func.func @transform_3(%arg0: i32) -> (i32, i32) {
    %c0_i32 = arith.constant 0 : i32
    %c0_i32_0 = arith.constant 0 : i32
    %c0_i32_1 = arith.constant 0 : i32
    return %c0_i32, %c0_i32_0 : i32, i32
  }
  func.func @transform_4(%arg0: i32) -> (i32, i32) {
    %c0_i32 = arith.constant 0 : i32
    %c0_i32_0 = arith.constant 0 : i32
    %c0_i32_1 = arith.constant 0 : i32
    return %c0_i32, %c0_i32_0 : i32, i32
  }
  func.func @transform_5(%arg0: i32) -> (i32, i32) {
    %c0_i32 = arith.constant 0 : i32
    %c0_i32_0 = arith.constant 0 : i32
    return %c0_i32, %arg0 : i32, i32
  }
}

</mosaic_0001>

<bundles_post_ra>
// kernel: geometry_encoding.3
= control target key start
LH: loop header
LB: loop body
LE: loop exit
PB: predicated region body
PF: predicated region fallthrough
CT: control target
= control target key end

     0   :  { %s785_s18 = smov 0   ;;  %s787_s19 = smov 0   ;;  %s983_s0 = inlined_call_operand.vmem [shape: f32[32,2048], index: 0, kind: input, shape index: {}]   ;;  %s984_s1 = inlined_call_operand.vmem [shape: f32[32,1], index: 1, kind: input, shape index: {}]   ;;  %s985_s2 = inlined_call_operand.vmem [shape: f32[32,1], index: 2, kind: input, shape index: {}]   ;;  %s986_s3 = inlined_call_operand.vmem [shape: f32[32,32], index: 3, kind: input, shape index: {}]   ;;  %s987_s4 = inlined_call_operand.vmem [shape: f32[32,1], index: 4, kind: input, shape index: {}]   ;;  %s988_s5 = inlined_call_operand.vmem [shape: f32[32,2048], index: 5, kind: output, shape index: {}]  }
   0x1   :  { %s789_s20 = smov 0  }
   0x2 LB: > { %s669_s21 = sadd.s32 4294967295, %s752_s20   ;;  %s802_s22 = sadd.s32 1, %s752_s20   ;;  %s752_s20 = sphi %s789_s20, %s992_s20   ;;  %s748_s19 = sphi %s787_s19, %s991_s19   ;;  %s744_s18 = sphi %s785_s18, %s990_s18  }
   0x3   : > { %s19_s23 = ssub.s32 %s752_s20, %s802_s22  ;;  %s22_s24 = sadd.s32 1, %s748_s19 }
   0x4   : > { %p20_p0 = scmp.eq.s32.totalorder %s19_s23, 0  ;;  %p29_p1 = scmp.ne.s32.totalorder %s748_s19, %s744_s18 }
   0x5   : > { %p30_p2 = scmp.eq.s32.totalorder %s752_s20, 0  ;;  %p143_p3 = scmp.eq.s32.totalorder %s669_s21, 3 }
   0x6   : > { %s813_s25 = scalar_select %p20_p0, %s748_s19, %s22_s24  }
   0x7   : > { %p31_p4 = por %p30_p2, %p29_p1  ;;  %p815_p5 = por %p143_p3, %p29_p1 }
   0x8   : > { %p672_p6 = scmp.ge.s32.totalorder %s752_s20, 4 }
   0xa   : > { %177 = sbr.rel (%p672_p6) target bundleno = 35 (0x23), region = 32 }
   0xf   : > { %180 = sbr.rel (!%p31_p4) target bundleno = 35 (0x23), region = 36  ;;  %s182_s27 = sand.u32 (%p31_p4), 1, %s748_s19  }
  0x10   : > { %s700_s28 = sshll.u32 (%p31_p4), %s752_s20, 5  ;;  %s673_s29 = sshll.u32 (%p31_p4), %s182_s27, 7 }
  0x11   : > { %s825_s7 = scalar_lea.vmem (%p31_p4), %s983_s0, %s700_s28  ;;  %s184_s8 = scalar_lea.vmem (%p31_p4), [#allocation2], %s673_s29 }
  0x12   : > { %v200_v0 = vld [vmem:[%s825_s7] sm:$0xff] (%p31_p4)  ;;  %v202_v1 = vld [vmem:[%s825_s7 + $0x8] sm:$0xff] (%p31_p4)  ;;  %v204_v2 = vld [vmem:[%s825_s7 + $0x10] sm:$0xff] (%p31_p4) }
  0x13   : > { %201 = vst [vmem:[%s184_s8] sm:$0xff] (%p31_p4), %v200_v0  ;;  %v206_v3 = vld [vmem:[%s825_s7 + $0x18] sm:$0xff] (%p31_p4)  ;;  %v208_v4 = vld [vmem:[%s825_s7 + $0x80] sm:$0xff] (%p31_p4)  ;;  %v210_v5 = vld [vmem:[%s825_s7 + $0x88] sm:$0xff] (%p31_p4) }
  0x14   : > { %203 = vst [vmem:[%s184_s8 + $0x8] sm:$0xff] %v202_v1  ;;  %v212_v6 = vld [vmem:[%s825_s7 + $0x90] sm:$0xff]  ;;  %v214_v7 = vld [vmem:[%s825_s7 + $0x98] sm:$0xff]  ;;  %v216_v8 = vld [vmem:[%s825_s7 + $0x100] sm:$0xff] }
  0x15   : > { %205 = vst [vmem:[%s184_s8 + $0x10] sm:$0xff] %v204_v2  ;;  %v218_v9 = vld [vmem:[%s825_s7 + $0x108] sm:$0xff]  ;;  %v220_v10 = vld [vmem:[%s825_s7 + $0x110] sm:$0xff]  ;;  %v222_v11 = vld [vmem:[%s825_s7 + $0x118] sm:$0xff] }
  0x16   : > { %207 = vst [vmem:[%s184_s8 + $0x18] sm:$0xff] %v206_v3  ;;  %v224_v12 = vld [vmem:[%s825_s7 + $0x180] sm:$0xff]  ;;  %v226_v13 = vld [vmem:[%s825_s7 + $0x188] sm:$0xff]  ;;  %v228_v14 = vld [vmem:[%s825_s7 + $0x190] sm:$0xff] }
  0x17   : > { %209 = vst [vmem:[%s184_s8 + $0x20] sm:$0xff] %v208_v4  ;;  %v230_v15 = vld [vmem:[%s825_s7 + $0x198] sm:$0xff] }
  0x18   : > { %211 = vst [vmem:[%s184_s8 + $0x28] sm:$0xff] %v210_v5 }
  0x19   : > { %213 = vst [vmem:[%s184_s8 + $0x30] sm:$0xff] %v212_v6 }
  0x1a   : > { %215 = vst [vmem:[%s184_s8 + $0x38] sm:$0xff] %v214_v7 }
  0x1b   : > { %217 = vst [vmem:[%s184_s8 + $0x40] sm:$0xff] %v216_v8 }
  0x1c   : > { %219 = vst [vmem:[%s184_s8 + $0x48] sm:$0xff] %v218_v9 }
  0x1d   : > { %221 = vst [vmem:[%s184_s8 + $0x50] sm:$0xff] %v220_v10 }
  0x1e   : > { %223 = vst [vmem:[%s184_s8 + $0x58] sm:$0xff] %v222_v11 }
  0x1f   : > { %225 = vst [vmem:[%s184_s8 + $0x60] sm:$0xff] %v224_v12 }
  0x20   : > { %227 = vst [vmem:[%s184_s8 + $0x68] sm:$0xff] %v226_v13 }
  0x21   : > { %229 = vst [vmem:[%s184_s8 + $0x70] sm:$0xff] %v228_v14 }
  0x22   : > { %231 = vst [vmem:[%s184_s8 + $0x78] sm:$0xff] %v230_v15 }
  0x23 PF: > { %p676_p7 = scmp.ge.s32.totalorder %s752_s20, 1  ;;  %p236_p8 = scmp.lt.s32.totalorder %s752_s20, 5 }
  0x25   : > { %p237_p9 = pnand %p676_p7, %p236_p8 }
  0x26   : > { %s243_s15 = sand.u32 (!%p237_p9), 1, %s744_s18  }
  0x27   : > { %240 = sbr.rel (%p237_p9) target bundleno = 354 (0x162), region = 59  ;;  %s882_s16 = sshll.u32 (!%p237_p9), %s243_s15, 7 }
  0x28   : > { %s885_s17 = scalar_lea.vmem (!%p237_p9), [#allocation2], %s882_s16  ;;  %s932_s7 = scalar_lea.vmem (!%p237_p9), [#allocation3], %s882_s16 }
  0x2c   : > { %v330_v16 = vld [vmem:[%s985_s2 + $0x18] sm:$0xff]  ;;  %v754_v18 = vmov 0   ;;  %v329_v19 = vld [vmem:[%s985_s2 + $0x10] sm:$0xff]  ;;  %v288_v21 = vld [vmem:[%s984_s1 + $0x8] sm:$0xff]  ;;  %vm411_vm0 = vcmask 261120   ;;  %s701_s8 = sshll.u32 (%p815_p5), %s669_s21, 5 }
  0x2d   : > { %v290_v17 = vld [vmem:[%s984_s1 + $0x18] sm:$0xff]  ;;  %728 = vset.pattern.permute.xlu1 %v754_v18  ;;  %727 = vset.pattern.permute.xlu0 %v754_v18  ;;  %v289_v20 = vld [vmem:[%s984_s1 + $0x10] sm:$0xff]  ;;  %v287_v22 = vld [vmem:[%s984_s1] sm:$0xff]  ;;  %s565_s26 = scalar_lea.vmem (%p815_p5), %s988_s5, %s701_s8 }
  0x2e   : > { %348 = vperm.xlu1 %728, %v330_v16   ;;  %308 = vperm.xlu0 %727, %v290_v17   ;;  %v328_v23 = vld [vmem:[%s985_s2 + $0x8] sm:$0xff]  ;;  %v327_v24 = vld [vmem:[%s985_s2] sm:$0xff]  ;;  %v389_v27 = vld [vmem:[%s987_s4 + $0x10] sm:$0xff] }
  0x2f   : > { %729 = vset.pattern.permute.xlu2 %v754_v18  ;;  %v387_v25 = vld [vmem:[%s987_s4] sm:$0xff]  ;;  %v388_v26 = vld [vmem:[%s987_s4 + $0x8] sm:$0xff]  ;;  %v390_v28 = vld [vmem:[%s987_s4 + $0x18] sm:$0xff] }
  0x30   : > { %343 = vperm.xlu2 %729, %v329_v19   ;;  %v283_v29 = vld [vmem:[%s885_s17 + $0x60] sm:$0xff]  ;;  %v284_v30 = vld [vmem:[%s885_s17 + $0x68] sm:$0xff]  ;;  %v285_v31 = vld [vmem:[%s885_s17 + $0x70] sm:$0xff] }
  0x31   : > { %v286_v32 = vld [vmem:[%s885_s17 + $0x78] sm:$0xff]  ;;  %v279_v48 = vld [vmem:[%s885_s17 + $0x40] sm:$0xff]  ;;  %v280_v49 = vld [vmem:[%s885_s17 + $0x48] sm:$0xff] }
  0x32   : > { %v281_v50 = vld [vmem:[%s885_s17 + $0x50] sm:$0xff]  ;;  %v282_v51 = vld [vmem:[%s885_s17 + $0x58] sm:$0xff]  ;;  %v275_v62 = vld [vmem:[%s885_s17 + $0x20] sm:$0xff] }
  0x33   : > { %v276_v63 = vld [vmem:[%s885_s17 + $0x28] sm:$0xff]  ;;  %v271_v0 = vld [vmem:[%s885_s17] sm:$0xff]  ;;  %v277_v1 = vld [vmem:[%s885_s17 + $0x30] sm:$0xff] }
  0x34   : > { %v278_v2 = vld [vmem:[%s885_s17 + $0x38] sm:$0xff]  ;;  %v272_v3 = vld [vmem:[%s885_s17 + $0x8] sm:$0xff]  ;;  %v273_v9 = vld [vmem:[%s885_s17 + $0x10] sm:$0xff] }
  0x35   : > { %v274_v10 = vld [vmem:[%s885_s17 + $0x18] sm:$0xff] }
  0x36   : > { %303 = vperm.xlu0 %727, %v289_v20   ;;  %298 = vperm.xlu1 %728, %v288_v21  }
  0x38   : > { %293 = vperm.xlu2 %729, %v287_v22  }
  0x3e   : > { %338 = vperm.xlu0 %727, %v328_v23   ;;  %333 = vperm.xlu1 %728, %v327_v24  }
  0x40   : > { %393 = vperm.xlu2 %729, %v387_v25  }
  0x46   : > { %398 = vperm.xlu0 %727, %v388_v26   ;;  %403 = vperm.xlu1 %728, %v389_v27  }
  0x48   : > { %408 = vperm.xlu2 %729, %v390_v28  }
  0x8a   : > { %v344_v39 = vpop.permute.xlu2 %343 }
  0x92   : > { %v294_v4 = vpop.permute.xlu2 %293 }
  0x93   : > { %v311_v12 = vmul.f32 %v294_v4, %v271_v0  ;;  %v312_v18 = vmul.f32 %v294_v4, %v272_v3  ;;  %v313_v19 = vmul.f32 %v294_v4, %v273_v9  ;;  %v314_v20 = vmul.f32 %v294_v4, %v274_v10 }
  0xa0   : > { %v349_v33 = vpop.permute.xlu1 %348  ;;  %v309_v34 = vpop.permute.xlu0 %308 }
  0xa1   : > { %v323_v35 = vmul.f32 %v309_v34, %v283_v29  ;;  %v324_v36 = vmul.f32 %v309_v34, %v284_v30  ;;  %v325_v37 = vmul.f32 %v309_v34, %v285_v31  ;;  %v326_v38 = vmul.f32 %v309_v34, %v286_v32 }
  0xa3   : > { %v363_v40 = vadd.f32 %v349_v33, %v323_v35  ;;  %v364_v41 = vadd.f32 %v349_v33, %v324_v36  ;;  %v365_v42 = vadd.f32 %v349_v33, %v325_v37  ;;  %v366_v43 = vadd.f32 %v349_v33, %v326_v38  ;;  %v383_v37 = vld [vmem:[%s986_s3] sm:$0xff]  ;;  %v384_v38 = vld [vmem:[%s986_s3 + $0x8] sm:$0xff] }
  0xa5   : > { %v379_v44 = vmax.f32 %v363_v40, 0.0  ;;  %v380_v45 = vmax.f32 %v364_v41, 0.0  ;;  %v381_v46 = vmax.f32 %v365_v42, 0.0  ;;  %v382_v47 = vmax.f32 %v366_v43, 0.0  ;;  %v386_v40 = vld [vmem:[%s986_s3 + $0x18] sm:$0xff]  ;;  %v394_v41 = vpop.permute.xlu2 %393 }
  0xa7   : > { %436 = vmatpush.msra.mxu0 %v379_v44  ;;  %465 = vmatpush.msra.mxu1 %v380_v45 }
  0xa8   : > { %494 = vmatpush.msra.mxu2 %v381_v46  ;;  %523 = vmatpush.msra.mxu3 %v382_v47  ;;  %v304_v52 = vpop.permute.xlu0 %303  ;;  %v299_v53 = vpop.permute.xlu1 %298 }
  0xa9   : > { %v319_v54 = vmul.f32 %v304_v52, %v279_v48  ;;  %v320_v55 = vmul.f32 %v304_v52, %v280_v49  ;;  %v321_v56 = vmul.f32 %v304_v52, %v281_v50  ;;  %v322_v57 = vmul.f32 %v304_v52, %v282_v51 }
  0xaa   : > { %v315_v11 = vmul.f32 %v299_v53, %v275_v62  ;;  %v316_v13 = vmul.f32 %v299_v53, %v276_v63  ;;  %v317_v14 = vmul.f32 %v299_v53, %v277_v1  ;;  %v318_v15 = vmul.f32 %v299_v53, %v278_v2 }
  0xab   : > { %v359_v58 = vadd.f32 %v344_v39, %v319_v54  ;;  %v360_v59 = vadd.f32 %v344_v39, %v320_v55  ;;  %v361_v60 = vadd.f32 %v344_v39, %v321_v56  ;;  %v362_v61 = vadd.f32 %v344_v39, %v322_v57  ;;  %v385_v39 = vld [vmem:[%s986_s3 + $0x10] sm:$0xff] }
  0xad   : > { %v375_v5 = vmax.f32 %v359_v58, 0.0  ;;  %v376_v6 = vmax.f32 %v360_v59, 0.0  ;;  %v377_v7 = vmax.f32 %v361_v60, 0.0  ;;  %v378_v8 = vmax.f32 %v362_v61, 0.0  ;;  %v409_v0 = vpop.permute.xlu2 %408 }
  0xaf   : > { %437 = vmatpush.msra.mxu0 %v375_v5  ;;  %466 = vmatpush.msra.mxu1 %v376_v6 }
  0xb0   : > { %495 = vmatpush.msra.mxu2 %v377_v7  ;;  %524 = vmatpush.msra.mxu3 %v378_v8  ;;  %v339_v16 = vpop.permute.xlu0 %338  ;;  %v334_v17 = vpop.permute.xlu1 %333 }
  0xb1   : > { %v355_v21 = vadd.f32 %v339_v16, %v315_v11  ;;  %v356_v22 = vadd.f32 %v339_v16, %v316_v13  ;;  %v357_v23 = vadd.f32 %v339_v16, %v317_v14  ;;  %v358_v24 = vadd.f32 %v339_v16, %v318_v15 }
  0xb2   : > { %v351_v25 = vadd.f32 %v334_v17, %v311_v12  ;;  %v352_v26 = vadd.f32 %v334_v17, %v312_v18  ;;  %v353_v27 = vadd.f32 %v334_v17, %v313_v19  ;;  %v354_v28 = vadd.f32 %v334_v17, %v314_v20 }
  0xb3   : > { %v371_v29 = vmax.f32 %v355_v21, 0.0  ;;  %v372_v30 = vmax.f32 %v356_v22, 0.0  ;;  %v373_v31 = vmax.f32 %v357_v23, 0.0  ;;  %v374_v32 = vmax.f32 %v358_v24, 0.0 }
  0xb4   : > { %v367_v33 = vmax.f32 %v351_v25, 0.0  ;;  %v368_v34 = vmax.f32 %v352_v26, 0.0  ;;  %v369_v35 = vmax.f32 %v353_v27, 0.0  ;;  %v370_v36 = vmax.f32 %v354_v28, 0.0 }
  0xb5   : > { %438 = vmatpush.msra.mxu0 %v371_v29  ;;  %467 = vmatpush.msra.mxu1 %v372_v30 }
  0xb6   : > { %496 = vmatpush.msra.mxu2 %v373_v31  ;;  %525 = vmatpush.msra.mxu3 %v374_v32 }
  0xb7   : > { %439 = vmatpush.msra.mxu0 %v367_v33  ;;  %468 = vmatpush.msra.mxu1 %v368_v34 }
  0xb8   : > { %497 = vmatpush.msra.mxu2 %v369_v35  ;;  %526 = vmatpush.msra.mxu3 %v370_v36  ;;  %v399_v46 = vpop.permute.xlu0 %398  ;;  %v404_v55 = vpop.permute.xlu1 %403 }
  0xb9   : > { %679 = vmatmul.msk.f32.vlgmr.msra.gmra.mxu0 %vm411_vm0, %v383_v37  ;;  %683 = vmatmul.msk.f32.vlgmr.msra.gmra.mxu1 %vm411_vm0, %v383_v37 }
  0xba   : > { %687 = vmatmul.msk.f32.vlgmr.msra.gmra.mxu2 %vm411_vm0, %v383_v37  ;;  %691 = vmatmul.msk.f32.vlgmr.msra.gmra.mxu3 %vm411_vm0, %v383_v37 }
  0xc1   : > { %680 = vmatmul.msk.f32.gmra.mxu0 %vm411_vm0, %v384_v38  ;;  %684 = vmatmul.msk.f32.gmra.mxu1 %vm411_vm0, %v384_v38 }
  0xc2   : > { %688 = vmatmul.msk.f32.gmra.mxu2 %vm411_vm0, %v384_v38  ;;  %692 = vmatmul.msk.f32.gmra.mxu3 %vm411_vm0, %v384_v38 }
  0xc9   : > { %681 = vmatmul.msk.f32.gmra.mxu0 %vm411_vm0, %v385_v39  ;;  %685 = vmatmul.msk.f32.gmra.mxu1 %vm411_vm0, %v385_v39 }
  0xca   : > { %689 = vmatmul.msk.f32.gmra.mxu2 %vm411_vm0, %v385_v39  ;;  %693 = vmatmul.msk.f32.gmra.mxu3 %vm411_vm0, %v385_v39 }
  0xd1   : > { %682 = vmatmul.msk.f32.gmra.mxu0 %vm411_vm0, %v386_v40  ;;  %686 = vmatmul.msk.f32.gmra.mxu1 %vm411_vm0, %v386_v40 }
  0xd2   : > { %690 = vmatmul.msk.f32.gmra.mxu2 %vm411_vm0, %v386_v40  ;;  %694 = vmatmul.msk.f32.gmra.mxu3 %vm411_vm0, %v386_v40 }
 0x136   : > { %v441_v42 = vpop.f32.mrf.mxu0  ;;  %v470_v43 = vpop.f32.mrf.mxu1 }
 0x137   : > { %v442_v44 = vadd.f32 %v441_v42, %v394_v41  ;;  %v471_v45 = vadd.f32 %v470_v43, %v394_v41 }
 0x139   : > { %540 = vst [vmem:[%s932_s7] sm:$0xff] %v442_v44 }
 0x13a   : > { %541 = vst [vmem:[%s932_s7 + $0x8] sm:$0xff] %v471_v45 }
 0x13d   : > { %v499_v47 = vpop.f32.mrf.mxu2  ;;  %v528_v48 = vpop.f32.mrf.mxu3 }
 0x13e   : > { %v500_v49 = vadd.f32 %v499_v47, %v394_v41  ;;  %v529_v50 = vadd.f32 %v528_v48, %v394_v41  ;;  %v444_v51 = vpop.f32.mrf.mxu0  ;;  %v473_v52 = vpop.f32.mrf.mxu1 }
 0x13f   : > { %v445_v53 = vadd.f32 %v444_v51, %v399_v46  ;;  %v474_v54 = vadd.f32 %v473_v52, %v399_v46 }
 0x140   : > { %542 = vst [vmem:[%s932_s7 + $0x10] sm:$0xff] %v500_v49  ;;  %v578_v13 = vld [vmem:[%s932_s7] sm:$0xff] (%p815_p5) }
 0x141   : > { %543 = vst [vmem:[%s932_s7 + $0x18] sm:$0xff] %v529_v50  ;;  %v580_v14 = vld [vmem:[%s932_s7 + $0x8] sm:$0xff] (%p815_p5) }
 0x142   : > { %544 = vst [vmem:[%s932_s7 + $0x20] sm:$0xff] %v445_v53 }
 0x143   : > { %545 = vst [vmem:[%s932_s7 + $0x28] sm:$0xff] %v474_v54 }
 0x144   : > { %579 = vst [vmem:[%s565_s26] sm:$0xff] (%p815_p5), %v578_v13 }
 0x145   : > { %v502_v56 = vpop.f32.mrf.mxu2  ;;  %v531_v57 = vpop.f32.mrf.mxu3  ;;  %581 = vst [vmem:[%s565_s26 + $0x8] sm:$0xff] (%p815_p5), %v580_v14 }
 0x146   : > { %v503_v58 = vadd.f32 %v502_v56, %v399_v46  ;;  %v532_v59 = vadd.f32 %v531_v57, %v399_v46  ;;  %v447_v60 = vpop.f32.mrf.mxu0  ;;  %v476_v61 = vpop.f32.mrf.mxu1 }
 0x147   : > { %v448_v62 = vadd.f32 %v447_v60, %v404_v55  ;;  %v477_v63 = vadd.f32 %v476_v61, %v404_v55  ;;  %v582_v15 = vld [vmem:[%s932_s7 + $0x10] sm:$0xff] (%p815_p5) }
 0x148   : > { %546 = vst [vmem:[%s932_s7 + $0x30] sm:$0xff] %v503_v58  ;;  %v584_v16 = vld [vmem:[%s932_s7 + $0x18] sm:$0xff] (%p815_p5) }
 0x149   : > { %547 = vst [vmem:[%s932_s7 + $0x38] sm:$0xff] %v532_v59  ;;  %v586_v17 = vld [vmem:[%s932_s7 + $0x20] sm:$0xff] (%p815_p5) }
 0x14a   : > { %548 = vst [vmem:[%s932_s7 + $0x40] sm:$0xff] %v448_v62  ;;  %v588_v18 = vld [vmem:[%s932_s7 + $0x28] sm:$0xff] (%p815_p5) }
 0x14b   : > { %549 = vst [vmem:[%s932_s7 + $0x48] sm:$0xff] %v477_v63 }
 0x14c   : > { %583 = vst [vmem:[%s565_s26 + $0x10] sm:$0xff] (%p815_p5), %v582_v15 }
 0x14d   : > { %v505_v1 = vpop.f32.mrf.mxu2  ;;  %v534_v2 = vpop.f32.mrf.mxu3  ;;  %585 = vst [vmem:[%s565_s26 + $0x18] sm:$0xff] (%p815_p5), %v584_v16 }
 0x14e   : > { %v506_v3 = vadd.f32 %v505_v1, %v404_v55  ;;  %v535_v4 = vadd.f32 %v534_v2, %v404_v55  ;;  %v450_v5 = vpop.f32.mrf.mxu0  ;;  %v479_v6 = vpop.f32.mrf.mxu1  ;;  %587 = vst [vmem:[%s565_s26 + $0x80] sm:$0xff] (%p815_p5), %v586_v17 }
 0x14f   : > { %v451_v7 = vadd.f32 %v450_v5, %v409_v0  ;;  %v480_v8 = vadd.f32 %v479_v6, %v409_v0  ;;  %v590_v19 = vld [vmem:[%s932_s7 + $0x30] sm:$0xff] (%p815_p5)  ;;  %589 = vst [vmem:[%s565_s26 + $0x88] sm:$0xff] (%p815_p5), %v588_v18 }
 0x150   : > { %550 = vst [vmem:[%s932_s7 + $0x50] sm:$0xff] %v506_v3  ;;  %v592_v20 = vld [vmem:[%s932_s7 + $0x38] sm:$0xff] (%p815_p5) }
 0x151   : > { %551 = vst [vmem:[%s932_s7 + $0x58] sm:$0xff] %v535_v4  ;;  %v594_v21 = vld [vmem:[%s932_s7 + $0x40] sm:$0xff] (%p815_p5) }
 0x152   : > { %552 = vst [vmem:[%s932_s7 + $0x60] sm:$0xff] %v451_v7  ;;  %v596_v22 = vld [vmem:[%s932_s7 + $0x48] sm:$0xff] (%p815_p5) }
 0x153   : > { %553 = vst [vmem:[%s932_s7 + $0x68] sm:$0xff] %v480_v8 }
 0x154   : > { %591 = vst [vmem:[%s565_s26 + $0x90] sm:$0xff] (%p815_p5), %v590_v19 }
 0x155   : > { %v508_v9 = vpop.f32.mrf.mxu2  ;;  %v537_v10 = vpop.f32.mrf.mxu3  ;;  %562 = sbr.rel (!%p815_p5) target bundleno = 354 (0x162), region = 67  ;;  %593 = vst [vmem:[%s565_s26 + $0x98] sm:$0xff] (%p815_p5), %v592_v20 }
 0x156   : > { %v509_v11 = vadd.f32 %v508_v9, %v409_v0  ;;  %v538_v12 = vadd.f32 %v537_v10, %v409_v0  ;;  %595 = vst [vmem:[%s565_s26 + $0x100] sm:$0xff] (%p815_p5), %v594_v21 }
 0x157   : > { %v598_v23 = vld [vmem:[%s932_s7 + $0x50] sm:$0xff] (%p815_p5)  ;;  %597 = vst [vmem:[%s565_s26 + $0x108] sm:$0xff] (%p815_p5), %v596_v22 }
 0x158   : > { %554 = vst [vmem:[%s932_s7 + $0x70] sm:$0xff] %v509_v11  ;;  %v600_v24 = vld [vmem:[%s932_s7 + $0x58] sm:$0xff] (%p815_p5) }
 0x159   : > { %555 = vst [vmem:[%s932_s7 + $0x78] sm:$0xff] %v538_v12  ;;  %v602_v25 = vld [vmem:[%s932_s7 + $0x60] sm:$0xff] (%p815_p5) }
 0x15a   : > { %599 = vst [vmem:[%s565_s26 + $0x110] sm:$0xff] %v598_v23  ;;  %v604_v26 = vld [vmem:[%s932_s7 + $0x68] sm:$0xff] }
 0x15b   : > { %601 = vst [vmem:[%s565_s26 + $0x118] sm:$0xff] %v600_v24 }
 0x15c   : > { %603 = vst [vmem:[%s565_s26 + $0x180] sm:$0xff] %v602_v25 }
 0x15d   : > { %605 = vst [vmem:[%s565_s26 + $0x188] sm:$0xff] %v604_v26 }
 0x15f   : > { %v606_v27 = vld [vmem:[%s932_s7 + $0x70] sm:$0xff] }
 0x160   : > { %v608_v28 = vld [vmem:[%s932_s7 + $0x78] sm:$0xff]  ;;  %607 = vst [vmem:[%s565_s26 + $0x190] sm:$0xff] %v606_v27 }
 0x161   : > { %609 = vst [vmem:[%s565_s26 + $0x198] sm:$0xff] %v608_v28 }
 0x162 PF: > { %p12_p10 = scmp.ge.s32.totalorder %s802_s22, 6   ;;  %s990_s18 = smov %s748_s19 }
 0x163   : > { %s991_s19 = smov %s813_s25  ;;  %s992_s20 = smov %s802_s22 }
 0x164   :  { %14 = sbr.rel (!%p12_p10) target bundleno = 2 (0x2), region = 121 }

// kernel: geometry_encoding.2
= control target key start
LH: loop header
LB: loop body
LE: loop exit
PB: predicated region body
PF: predicated region fallthrough
CT: control target
= control target key end

     0   :  { %s816_s15 = smov 0   ;;  %s818_s16 = smov 0   ;;  %s1145_s0 = inlined_call_operand.vmem [shape: f32[4,2048], index: 0, kind: input, shape index: {}]   ;;  %s1146_s1 = inlined_call_operand.vmem [shape: f32[32,4], index: 1, kind: input, shape index: {}]   ;;  %s1147_s2 = inlined_call_operand.vmem [shape: f32[32,1], index: 2, kind: input, shape index: {}]   ;;  %s1148_s3 = inlined_call_operand.vmem [shape: f32[32,2048], index: 3, kind: output, shape index: {0}]   ;;  %s1149_s4 = inlined_call_operand.vmem [shape: f32[4,32,2], index: 4, kind: output, shape index: {1}]  }
   0x1   :  { %s820_s17 = smov 0  }
   0x2 LB: > { %s829_s18 = sadd.s32 4294967295, %s785_s17   ;;  %s831_s19 = sadd.s32 1, %s785_s17   ;;  %s785_s17 = sphi %s820_s17, %s1153_s17   ;;  %s781_s16 = sphi %s818_s16, %s1152_s16   ;;  %s777_s15 = sphi %s816_s15, %s1151_s15  }
   0x3   : > { %s87_s20 = ssub.s32 %s785_s17, %s831_s19  ;;  %s90_s21 = sadd.s32 1, %s781_s16 }
   0x4   : > { %p88_p0 = scmp.eq.s32.totalorder %s87_s20, 0  ;;  %p100_p1 = scmp.ne.s32.totalorder %s781_s16, %s777_s15 }
   0x5   : > { %p101_p2 = scmp.eq.s32.totalorder %s829_s18, 3  ;;  %p710_p3 = scmp.ge.s32.totalorder %s785_s17, 1 }
   0x6   : > { %s839_s22 = scalar_select %p88_p0, %s781_s16, %s90_s21  }
   0x7   : > { %p841_p4 = por %p101_p2, %p100_p1  ;;  %p166_p5 = scmp.lt.s32.totalorder %s785_s17, 5 }
   0x9   : > { %p167_p6 = pnand %p710_p3, %p166_p5 }
   0xa   : > { %s712_s14 = sshll.u32 (!%p167_p6), %s829_s18, 2  ;;  %s186_s25 = sand.u32 (!%p167_p6), 1, %s777_s15  }
   0xb   : > { %170 = sbr.rel (%p167_p6) target bundleno = 336 (0x150), region = 32  ;;  %p197_p7 = scmp.lt.s32.totalorder (!%p167_p6), %s712_s14, 15 }
   0xc   : > { %s711_s15 = sshll.u32 (!%p167_p6), %s186_s25, 7  ;;  %p203_p8 = scmp.lt.s32.totalorder (!%p167_p6), %s829_s18, 3 }
   0xd   : > { %s1040_s26 = scalar_lea.vmem (!%p167_p6), [#allocation2], %s711_s15 }
  0x10   : > { %v212_v0 = vld [vmem:[%s1146_s1 + $0x10] sm:$0xff]  ;;  %v210_v1 = vld [vmem:[%s1146_s1] sm:$0xff]  ;;  %v787_v2 = vmov 1   ;;  %v788_v3 = vmov 0   ;;  %v213_v4 = vld [vmem:[%s1146_s1 + $0x18] sm:$0xff]  ;;  %v789_v6 = vmov 2  }
  0x11   : > { %753 = vset.pattern.permute.xlu0 %v787_v2  ;;  %751 = vset.pattern.permute.xlu1 %v788_v3  ;;  %v211_v5 = vld [vmem:[%s1146_s1 + $0x8] sm:$0xff]  ;;  %v444_v7 = vld [vmem:[%s1147_s2] sm:$0xff]  ;;  %v790_v8 = vmov 3   ;;  %v446_v10 = vld [vmem:[%s1147_s2 + $0x10] sm:$0xff]  ;;  %s1155_s14 = smov (!%p197_p7, %s712_s14), 15  ;;  %vm556_vm0 = vcmask 7168  }
  0x12   : > { %752 = vset.pattern.permute.xlu2 %v787_v2  ;;  %273 = vperm.xlu0 %753, %v212_v0   ;;  %v445_v9 = vld [vmem:[%s1147_s2 + $0x8] sm:$0xff]  ;;  %v447_v11 = vld [vmem:[%s1147_s2 + $0x18] sm:$0xff]  ;;  %s713_s17 = sshll.u32 %s1155_s14, 2  ;;  %vm561_vm1 = vcmask 15360   ;;  %s722_s6 = sshll.u32 (%p841_p4), %s829_s18, 5 }
  0x13   : > { %226 = vperm.xlu1 %751, %v212_v0   ;;  %265 = vperm.xlu2 %752, %v210_v1   ;;  %s200_s24 = scalar_lea.vmem %s1145_s0, %s713_s17  ;;  %s580_s9 = scalar_lea.vmem (%p841_p4), %s1148_s3, %s722_s6 }
  0x14   : > { %v208_v18 = vld [vmem:[%s200_s24] sm:$0xff]  ;;  %v209_v20 = vld [vmem:[%s200_s24 + $0x8] sm:$0xff]  ;;  %s204_s27 = scalar_select %p203_p8, %s829_s18, 3 }
  0x15   : > { %v280_v21 = vperm.slane %v208_v18, 1  ;;  %v281_v22 = vperm.slane %v208_v18, 5  ;;  %v282_v23 = vperm.slane %v209_v20, 1  ;;  %v283_v24 = vperm.slane %v209_v20, 5 }
  0x16   : > { %v340_v25 = vperm.slane %v208_v18, 2  ;;  %v341_v26 = vperm.slane %v208_v18, 6  ;;  %v236_v27 = vperm.slane %v208_v18, 0  ;;  %v237_v28 = vperm.slane %v208_v18, 4  ;;  %s721_s28 = sshll.u32 %s204_s27, 5 }
  0x17   : > { %v342_v29 = vperm.slane %v209_v20, 2  ;;  %v343_v30 = vperm.slane %v209_v20, 6  ;;  %v238_v31 = vperm.slane %v209_v20, 0  ;;  %v239_v32 = vperm.slane %v209_v20, 4  ;;  %s207_s5 = scalar_lea.vmem %s1149_s4, %s721_s28 }
  0x18   : > { %v883_v34 = vperm.slane %v280_v21, 1  ;;  %v885_v35 = vperm.slane %v281_v22, 1  ;;  %v887_v36 = vperm.slane %v282_v23, 1  ;;  %v889_v37 = vperm.slane %v283_v24, 1 }
  0x19   : > { %v400_v39 = vperm.slane %v208_v18, 3  ;;  %v401_v40 = vperm.slane %v208_v18, 7  ;;  %v891_v41 = vperm.slane %v340_v25, 2  ;;  %v893_v42 = vperm.slane %v341_v26, 2 }
  0x1a   : > { %757 = vset.pattern.permute.xlu0 %v789_v6  ;;  %v895_v43 = vperm.slane %v236_v27, 0  ;;  %v897_v44 = vperm.slane %v237_v28, 0  ;;  %v899_v45 = vperm.slane %v342_v29, 2  ;;  %v901_v46 = vperm.slane %v343_v30, 2 }
  0x1b   : > { %231 = vperm.xlu1 %751, %v213_v4   ;;  %337 = vperm.xlu0 %757, %v213_v4   ;;  %v903_v47 = vperm.slane %v238_v31, 0  ;;  %v905_v48 = vperm.slane %v239_v32, 0  ;;  %v402_v52 = vperm.slane %v209_v20, 3  ;;  %v403_v53 = vperm.slane %v209_v20, 7 }
  0x1c   : > { %269 = vperm.xlu2 %752, %v211_v5   ;;  %v911_v56 = vperm.slane %v400_v39, 3  ;;  %v913_v57 = vperm.slane %v401_v40, 3 }
  0x23   : > { %754 = vset.pattern.permute.xlu1 %v787_v2  ;;  %758 = vset.pattern.permute.xlu0 %v788_v3 }
  0x24   : > { %277 = vperm.xlu1 %754, %v213_v4   ;;  %755 = vset.pattern.permute.xlu2 %v789_v6 }
  0x25   : > { %216 = vperm.xlu0 %758, %v210_v1   ;;  %325 = vperm.xlu2 %755, %v210_v1  }
  0x2c   : > { %756 = vset.pattern.permute.xlu1 %v789_v6 }
  0x2d   : > { %329 = vperm.xlu1 %756, %v211_v5   ;;  %221 = vperm.xlu0 %758, %v211_v5  }
  0x2e   : > { %333 = vperm.xlu2 %755, %v212_v0  }
  0x35   : > { %759 = vset.pattern.permute.xlu1 %v790_v8  ;;  %450 = vperm.xlu0 %758, %v444_v7  }
  0x36   : > { %385 = vperm.xlu1 %759, %v210_v1   ;;  %760 = vset.pattern.permute.xlu2 %v790_v8 }
  0x37   : > { %389 = vperm.xlu2 %760, %v211_v5   ;;  %v933_v5 = vperm.slane %v403_v53, 3 }
  0x3e   : > { %393 = vperm.xlu1 %759, %v212_v0  }
  0x3f   : > { %397 = vperm.xlu2 %760, %v213_v4   ;;  %v931_v4 = vperm.slane %v402_v52, 3 }
  0x46   : > { %761 = vset.pattern.permute.xlu1 %v788_v3 }
  0x47   : > { %455 = vperm.xlu1 %761, %v445_v9   ;;  %762 = vset.pattern.permute.xlu2 %v788_v3 }
  0x48   : > { %460 = vperm.xlu2 %762, %v446_v10  }
  0x4f   : > { %465 = vperm.xlu1 %761, %v447_v11  }
  0x6d   : > { %v266_v12 = vpop.permute.xlu2 %265 }
  0x6e   : > { %v292_v50 = vmul.f32 %v883_v34, %v266_v12  ;;  %v293_v51 = vmul.f32 %v885_v35, %v266_v12  ;;  %v294_v54 = vmul.f32 %v887_v36, %v266_v12  ;;  %v295_v55 = vmul.f32 %v889_v37, %v266_v12 }
  0x76   : > { %v870_v13 = vpop.permute.xlu2 %269 }
  0x77   : > { %v925_v2 = vmul.f32 %v883_v34, %v870_v13  ;;  %v929_v3 = vmul.f32 %v885_v35, %v870_v13  ;;  %v299_v39 = vmul.f32 %v889_v37, %v870_v13 }
  0x7f   : > { %v877_v17 = vpop.permute.xlu2 %325 }
  0x80   : > { %v352_v24 = vmul.f32 %v891_v41, %v877_v17  ;;  %v353_v25 = vmul.f32 %v893_v42, %v877_v17  ;;  %v354_v26 = vmul.f32 %v899_v45, %v877_v17  ;;  %v355_v27 = vmul.f32 %v901_v46, %v877_v17 }
  0x84   : > { %v274_v15 = vpop.permute.xlu0 %273 }
  0x85   : > { %v227_v14 = vpop.permute.xlu1 %226  ;;  %v300_v58 = vmul.f32 %v883_v34, %v274_v15  ;;  %v301_v59 = vmul.f32 %v885_v35, %v274_v15  ;;  %v302_v62 = vmul.f32 %v887_v36, %v274_v15  ;;  %v303_v63 = vmul.f32 %v889_v37, %v274_v15 }
  0x86   : > { %v256_v60 = vmul.f32 %v895_v43, %v227_v14  ;;  %v257_v61 = vmul.f32 %v897_v44, %v227_v14  ;;  %v258_v0 = vmul.f32 %v903_v47, %v227_v14  ;;  %v259_v1 = vmul.f32 %v905_v48, %v227_v14 }
  0x88   : > { %v334_v38 = vpop.permute.xlu2 %333  ;;  %v316_v12 = vadd.f32 %v300_v58, %v256_v60  ;;  %v317_v14 = vadd.f32 %v301_v59, %v257_v61  ;;  %v318_v20 = vadd.f32 %v302_v62, %v258_v0  ;;  %v319_v21 = vadd.f32 %v303_v63, %v259_v1 }
  0x89   : > { %v360_v15 = vmul.f32 %v891_v41, %v334_v38  ;;  %v361_v18 = vmul.f32 %v893_v42, %v334_v38  ;;  %v362_v22 = vmul.f32 %v899_v45, %v334_v38  ;;  %v363_v23 = vmul.f32 %v901_v46, %v334_v38 }
  0x8a   : > { %v298_v38 = vmul.f32 %v887_v36, %v870_v13 }
  0x8b   : > { %v959_v40 = vadd.f32 %v360_v15, %v316_v12  ;;  %v963_v52 = vadd.f32 %v362_v22, %v318_v20  ;;  %v965_v53 = vadd.f32 %v363_v23, %v319_v21 }
  0x8d   : > { %v875_v16 = vpop.permute.xlu1 %231  ;;  %v879_v19 = vpop.permute.xlu0 %337 }
  0x8e   : > { %v969_v17 = vmul.f32 %v895_v43, %v875_v16  ;;  %v978_v13 = vmul.f32 %v903_v47, %v875_v16 }
  0x91   : > { %v937_v7 = vpop.permute.xlu2 %389 }
  0x96   : > { %v881_v33 = vpop.permute.xlu1 %277 }
  0x97   : > { %v217_v49 = vpop.permute.xlu0 %216 }
  0x98   : > { %v248_v8 = vmul.f32 %v895_v43, %v217_v49  ;;  %v249_v9 = vmul.f32 %v897_v44, %v217_v49  ;;  %v250_v10 = vmul.f32 %v903_v47, %v217_v49  ;;  %v251_v11 = vmul.f32 %v905_v48, %v217_v49 }
  0x99   : > { %v961_v49 = vadd.f32 %v361_v18, %v317_v14  ;;  %v1012_v12 = vpop.permute.xlu2 %397 }
  0x9a   : > { %v308_v28 = vadd.f32 %v292_v50, %v248_v8  ;;  %v309_v29 = vadd.f32 %v293_v51, %v249_v9  ;;  %v310_v30 = vadd.f32 %v294_v54, %v250_v10  ;;  %v311_v31 = vadd.f32 %v295_v55, %v251_v11 }
  0x9b   : > { %v973_v50 = vmul.f32 %v897_v44, %v875_v16  ;;  %v982_v51 = vmul.f32 %v905_v48, %v875_v16  ;;  %v986_v54 = vmul.f32 %v891_v41, %v879_v19  ;;  %v990_v55 = vmul.f32 %v893_v42, %v879_v19 }
  0x9c   : > { %v368_v59 = vadd.f32 %v352_v24, %v308_v28  ;;  %v369_v60 = vadd.f32 %v353_v25, %v309_v29  ;;  %v370_v61 = vadd.f32 %v354_v26, %v310_v30  ;;  %v371_v62 = vadd.f32 %v355_v27, %v311_v31 }
  0x9d   : > { %v998_v8 = vmul.f32 %v899_v45, %v879_v19  ;;  %v1002_v9 = vmul.f32 %v901_v46, %v879_v19  ;;  %v1006_v10 = vmul.f32 %v911_v56, %v937_v7  ;;  %v1010_v11 = vmul.f32 %v913_v57, %v937_v7 }
  0x9e   : > { %v418_v25 = vmul.f32 %v931_v4, %v937_v7  ;;  %v419_v29 = vmul.f32 %v933_v5, %v937_v7  ;;  %v307_v30 = vmul.f32 %v889_v37, %v881_v33 }
  0x9f   : > { %v935_v6 = vpop.permute.xlu1 %329  ;;  %v222_v32 = vpop.permute.xlu0 %221 }
  0xa0   : > { %v252_v21 = vmul.f32 %v895_v43, %v222_v32  ;;  %v253_v22 = vmul.f32 %v897_v44, %v222_v32  ;;  %v254_v19 = vmul.f32 %v903_v47, %v222_v32  ;;  %v255_v23 = vmul.f32 %v905_v48, %v222_v32 }
  0xa1   : > { %v304_v43 = vmul.f32 %v883_v34, %v881_v33  ;;  %v305_v44 = vmul.f32 %v885_v35, %v881_v33  ;;  %v306_v48 = vmul.f32 %v887_v36, %v881_v33  ;;  %v356_v31 = vmul.f32 %v891_v41, %v935_v6 }
  0xa2   : > { %v312_v35 = vadd.f32 %v925_v2, %v252_v21  ;;  %v313_v36 = vadd.f32 %v929_v3, %v253_v22  ;;  %v314_v7 = vadd.f32 %v298_v38, %v254_v19  ;;  %v315_v33 = vadd.f32 %v299_v39, %v255_v23  ;;  %v461_v39 = vpop.permute.xlu2 %460 }
  0xa3   : > { %v357_v2 = vmul.f32 %v893_v42, %v935_v6  ;;  %v358_v3 = vmul.f32 %v899_v45, %v935_v6  ;;  %v359_v38 = vmul.f32 %v901_v46, %v935_v6  ;;  %v424_v19 = vmul.f32 %v911_v56, %v1012_v12 }
  0xa4   : > { %v372_v45 = vadd.f32 %v356_v31, %v312_v35 }
  0xa7   : > { %v451_v24 = vpop.permute.xlu0 %450 }
  0xa8   : > { %v386_v58 = vpop.permute.xlu1 %385 }
  0xa9   : > { %v412_v63 = vmul.f32 %v911_v56, %v386_v58  ;;  %v413_v0 = vmul.f32 %v913_v57, %v386_v58  ;;  %v414_v16 = vmul.f32 %v931_v4, %v386_v58  ;;  %v415_v1 = vmul.f32 %v933_v5, %v386_v58 }
  0xab   : > { %v428_v14 = vadd.f32 %v412_v63, %v368_v59  ;;  %v429_v15 = vadd.f32 %v413_v0, %v369_v60  ;;  %v430_v18 = vadd.f32 %v414_v16, %v370_v61  ;;  %v431_v20 = vadd.f32 %v415_v1, %v371_v62 }
  0xac   : > { %v373_v16 = vadd.f32 %v357_v2, %v313_v36  ;;  %v374_v1 = vadd.f32 %v358_v3, %v314_v7  ;;  %v427_v36 = vmul.f32 %v933_v5, %v1012_v12 }
  0xad   : > { %v1020_v26 = vadd.f32 %v451_v24, %v428_v14  ;;  %v1022_v27 = vadd.f32 %v451_v24, %v429_v15  ;;  %v1024_v28 = vadd.f32 %v451_v24, %v430_v18  ;;  %v1032_v47 = vadd.f32 %v451_v24, %v431_v20 }
  0xae   : > { %v375_v15 = vadd.f32 %v359_v38, %v315_v33  ;;  %v320_v18 = vadd.f32 %v304_v43, %v969_v17  ;;  %v432_v17 = vadd.f32 %v1006_v10, %v372_v45  ;;  %v434_v23 = vadd.f32 %v418_v25, %v374_v1 }
  0xaf   : > { %484 = vst [vmem:[%s1040_s26] sm:$0xff] %v1020_v26  ;;  %v500_v34 = vadd.f32 %v1022_v27, %v1020_v26 }
  0xb0   : > { %485 = vst [vmem:[%s1040_s26 + $0x8] sm:$0xff] %v1022_v27  ;;  %v394_v37 = vpop.permute.xlu1 %393  ;;  %v435_v43 = vadd.f32 %v419_v29, %v375_v15  ;;  %v380_v10 = vadd.f32 %v986_v54, %v320_v18 }
  0xb1   : > { %486 = vst [vmem:[%s1040_s26 + $0x10] sm:$0xff] %v1024_v28  ;;  %v420_v41 = vmul.f32 %v911_v56, %v394_v37  ;;  %v421_v32 = vmul.f32 %v913_v57, %v394_v37  ;;  %v422_v58 = vmul.f32 %v931_v4, %v394_v37  ;;  %v423_v59 = vmul.f32 %v933_v5, %v394_v37 }
  0xb2   : > { %487 = vst [vmem:[%s1040_s26 + $0x18] sm:$0xff] %v1032_v47  ;;  %v501_v60 = vadd.f32 %v500_v34, %v1024_v28  ;;  %v440_v37 = vadd.f32 %v424_v19, %v380_v10 }
  0xb3   : > { %v436_v61 = vadd.f32 %v420_v41, %v959_v40  ;;  %v437_v62 = vadd.f32 %v421_v32, %v961_v49  ;;  %v438_v63 = vadd.f32 %v422_v58, %v963_v52  ;;  %v439_v42 = vadd.f32 %v423_v59, %v965_v53 }
  0xb4   : > { %v502_v0 = vadd.f32 %v501_v60, %v1032_v47  ;;  %v321_v40 = vadd.f32 %v305_v44, %v973_v50  ;;  %v322_v49 = vadd.f32 %v306_v48, %v978_v13  ;;  %v323_v53 = vadd.f32 %v307_v30, %v982_v51 }
  0xb5   : > { %v476_v46 = vadd.f32 %v461_v39, %v436_v61  ;;  %v477_v6 = vadd.f32 %v461_v39, %v437_v62  ;;  %v478_v14 = vadd.f32 %v461_v39, %v438_v63  ;;  %v479_v52 = vadd.f32 %v461_v39, %v439_v42 }
  0xb6   : > { %503 = vadd.xlane.f32.xlu2 %v502_v0  ;;  %v433_v50 = vadd.f32 %v1010_v11, %v373_v16  ;;  %v425_v13 = vmul.f32 %v913_v57, %v1012_v12  ;;  %v426_v51 = vmul.f32 %v931_v4, %v1012_v12  ;;  %v381_v57 = vadd.f32 %v990_v55, %v321_v40 }
  0xb7   : > { %492 = vst [vmem:[%s1040_s26 + $0x40] sm:$0xff] %v476_v46  ;;  %v510_v20 = vadd.f32 %v477_v6, %v476_v46  ;;  %v528_v21 = vmul.f32 %v476_v46, %v476_v46  ;;  %v529_v22 = vmul.f32 %v477_v6, %v477_v6  ;;  %v382_v4 = vadd.f32 %v998_v8, %v322_v49 }
  0xb8   : > { %493 = vst [vmem:[%s1040_s26 + $0x48] sm:$0xff] %v477_v6  ;;  %v383_v7 = vadd.f32 %v1002_v9, %v323_v53  ;;  %v530_v54 = vmul.f32 %v478_v14, %v478_v14  ;;  %v441_v41 = vadd.f32 %v425_v13, %v381_v57  ;;  %v531_v5 = vmul.f32 %v479_v52, %v479_v52 }
  0xb9   : > { %494 = vst [vmem:[%s1040_s26 + $0x50] sm:$0xff] %v478_v14  ;;  %v456_v24 = vpop.permute.xlu1 %455  ;;  %v511_v44 = vadd.f32 %v510_v20, %v478_v14  ;;  %v546_v31 = vadd.f32 %v529_v22, %v528_v21  ;;  %v442_v32 = vadd.f32 %v426_v51, %v382_v4  ;;  %v520_v63 = vmul.f32 %v1020_v26, %v1020_v26 }
  0xba   : > { %495 = vst [vmem:[%s1040_s26 + $0x58] sm:$0xff] %v479_v52  ;;  %v472_v56 = vadd.f32 %v456_v24, %v432_v17  ;;  %v473_v48 = vadd.f32 %v456_v24, %v433_v50  ;;  %v474_v30 = vadd.f32 %v456_v24, %v434_v23  ;;  %v475_v11 = vadd.f32 %v456_v24, %v435_v43 }
  0xbb   : > { %v512_v25 = vadd.f32 %v511_v44, %v479_v52  ;;  %v547_v55 = vadd.f32 %v546_v31, %v530_v54  ;;  %v443_v2 = vadd.f32 %v427_v36, %v383_v7  ;;  %v521_v42 = vmul.f32 %v1022_v27, %v1022_v27  ;;  %v593_v44 = vld [vmem:[%s1040_s26] sm:$0xff] (%p841_p4) }
  0xbc   : > { %488 = vst [vmem:[%s1040_s26 + $0x20] sm:$0xff] %v472_v56  ;;  %v505_v34 = vadd.f32 %v473_v48, %v472_v56  ;;  %v524_v29 = vmul.f32 %v472_v56, %v472_v56  ;;  %v525_v35 = vmul.f32 %v473_v48, %v473_v48  ;;  %v526_v38 = vmul.f32 %v474_v30, %v474_v30  ;;  %v595_v56 = vld [vmem:[%s1040_s26 + $0x8] sm:$0xff] (%p841_p4) }
  0xbd   : > { %489 = vst [vmem:[%s1040_s26 + $0x28] sm:$0xff] %v473_v48  ;;  %513 = vadd.xlane.f32.xlu1 %v512_v25  ;;  %v548_v60 = vadd.f32 %v547_v55, %v531_v5  ;;  %v527_v0 = vmul.f32 %v475_v11, %v475_v11  ;;  %v536_v46 = vadd.f32 %v521_v42, %v520_v63  ;;  %v597_v48 = vld [vmem:[%s1040_s26 + $0x10] sm:$0xff] (%p841_p4) }
  0xbe   : > { %490 = vst [vmem:[%s1040_s26 + $0x30] sm:$0xff] %v474_v30  ;;  %v506_v33 = vadd.f32 %v505_v34, %v474_v30  ;;  %v541_v58 = vadd.f32 %v525_v35, %v524_v29  ;;  %v522_v6 = vmul.f32 %v1024_v28, %v1024_v28  ;;  %v523_v27 = vmul.f32 %v1032_v47, %v1032_v47  ;;  %v599_v30 = vld [vmem:[%s1040_s26 + $0x18] sm:$0xff] (%p841_p4)  ;;  %v609_v31 = vld [vmem:[%s1040_s26 + $0x40] sm:$0xff] (%p841_p4) }
  0xbf   : > { %491 = vst [vmem:[%s1040_s26 + $0x38] sm:$0xff] %v475_v11  ;;  %v611_v4 = vld [vmem:[%s1040_s26 + $0x48] sm:$0xff] (%p841_p4) }
  0xc0   : > { %v507_v8 = vadd.f32 %v506_v33, %v475_v11  ;;  %v542_v61 = vadd.f32 %v541_v58, %v526_v38  ;;  %v537_v26 = vadd.f32 %v536_v46, %v522_v6  ;;  %594 = vst [vmem:[%s580_s9] sm:$0xff] (%p841_p4), %v593_v44  ;;  %v613_v34 = vld [vmem:[%s1040_s26 + $0x50] sm:$0xff] (%p841_p4) }
  0xc1   : > { %v466_v59 = vpop.permute.xlu1 %465  ;;  %596 = vst [vmem:[%s580_s9 + $0x8] sm:$0xff] (%p841_p4), %v595_v56  ;;  %v615_v29 = vld [vmem:[%s1040_s26 + $0x58] sm:$0xff] (%p841_p4) }
  0xc2   : > { %v480_v12 = vadd.f32 %v466_v59, %v440_v37  ;;  %v481_v3 = vadd.f32 %v466_v59, %v441_v41  ;;  %v482_v9 = vadd.f32 %v466_v59, %v442_v32  ;;  %508 = vadd.xlane.f32.xlu0 %v507_v8  ;;  %v483_v39 = vadd.f32 %v466_v59, %v443_v2 }
  0xc3   : > { %v543_v16 = vadd.f32 %v542_v61, %v527_v0  ;;  %v538_v18 = vadd.f32 %v537_v26, %v523_v27  ;;  %v601_v10 = vld [vmem:[%s1040_s26 + $0x20] sm:$0xff] (%p841_p4)  ;;  %598 = vst [vmem:[%s580_s9 + $0x10] sm:$0xff] (%p841_p4), %v597_v48 }
  0xc4   : > { %496 = vst [vmem:[%s1040_s26 + $0x60] sm:$0xff] %v480_v12  ;;  %v515_v62 = vadd.f32 %v481_v3, %v480_v12  ;;  %v532_v14 = vmul.f32 %v480_v12, %v480_v12  ;;  %v533_v15 = vmul.f32 %v481_v3, %v481_v3  ;;  %v534_v49 = vmul.f32 %v482_v9, %v482_v9  ;;  %v603_v11 = vld [vmem:[%s1040_s26 + $0x28] sm:$0xff] (%p841_p4) }
  0xc5   : > { %497 = vst [vmem:[%s1040_s26 + $0x68] sm:$0xff] %v481_v3  ;;  %549 = vadd.xlane.f32.xlu1 %v548_v60  ;;  %v535_v53 = vmul.f32 %v483_v39, %v483_v39  ;;  %v605_v25 = vld [vmem:[%s1040_s26 + $0x30] sm:$0xff] (%p841_p4) }
  0xc6   : > { %498 = vst [vmem:[%s1040_s26 + $0x70] sm:$0xff] %v482_v9  ;;  %v516_v45 = vadd.f32 %v515_v62, %v482_v9  ;;  %v551_v40 = vadd.f32 %v533_v15, %v532_v14  ;;  %v607_v57 = vld [vmem:[%s1040_s26 + $0x38] sm:$0xff] (%p841_p4) }
  0xc7   : > { %499 = vst [vmem:[%s1040_s26 + $0x78] sm:$0xff] %v483_v39 }
  0xc8   : > { %v517_v1 = vadd.f32 %v516_v45, %v483_v39  ;;  %v552_v52 = vadd.f32 %v551_v40, %v534_v49  ;;  %600 = vst [vmem:[%s580_s9 + $0x18] sm:$0xff] (%p841_p4), %v599_v30 }
  0xc9   : > { %602 = vst [vmem:[%s580_s9 + $0x80] sm:$0xff] (%p841_p4), %v601_v10 }
  0xca   : > { %544 = vadd.xlane.f32.xlu0 %v543_v16  ;;  %518 = vadd.xlane.f32.xlu2 %v517_v1  ;;  %v553_v20 = vadd.f32 %v552_v52, %v535_v53  ;;  %604 = vst [vmem:[%s580_s9 + $0x88] sm:$0xff] (%p841_p4), %v603_v11 }
  0xcb   : > { %606 = vst [vmem:[%s580_s9 + $0x90] sm:$0xff] (%p841_p4), %v605_v25  ;;  %v617_v35 = vld [vmem:[%s1040_s26 + $0x60] sm:$0xff] (%p841_p4) }
  0xcc   : > { %608 = vst [vmem:[%s580_s9 + $0x98] sm:$0xff] (%p841_p4), %v607_v57  ;;  %v619_v36 = vld [vmem:[%s1040_s26 + $0x68] sm:$0xff] (%p841_p4) }
  0xcd   : > { %610 = vst [vmem:[%s580_s9 + $0x100] sm:$0xff] (%p841_p4), %v609_v31  ;;  %v621_v7 = vld [vmem:[%s1040_s26 + $0x70] sm:$0xff] (%p841_p4) }
  0xce   : > { %612 = vst [vmem:[%s580_s9 + $0x108] sm:$0xff] (%p841_p4), %v611_v4  ;;  %v623_v54 = vld [vmem:[%s1040_s26 + $0x78] sm:$0xff] (%p841_p4) }
  0xcf   : > { %614 = vst [vmem:[%s580_s9 + $0x110] sm:$0xff] (%p841_p4), %v613_v34 }
  0xd0   : > { %616 = vst [vmem:[%s580_s9 + $0x118] sm:$0xff] (%p841_p4), %v615_v29 }
  0xd1   : > { %618 = vst [vmem:[%s580_s9 + $0x180] sm:$0xff] (%p841_p4), %v617_v35 }
  0xd2   : > { %539 = vadd.xlane.f32.xlu2 %v538_v18  ;;  %620 = vst [vmem:[%s580_s9 + $0x188] sm:$0xff] (%p841_p4), %v619_v36 }
  0xd3   : > { %622 = vst [vmem:[%s580_s9 + $0x190] sm:$0xff] (%p841_p4), %v621_v7 }
  0xd4   : > { %624 = vst [vmem:[%s580_s9 + $0x198] sm:$0xff] (%p841_p4), %v623_v54 }
  0xda   : > { %554 = vadd.xlane.f32.xlu2 %v553_v20 }
 0x129   : > { %v504_v22 = vpop.xlane.xlu2 %503 }
 0x130   : > { %v514_v21 = vpop.xlane.xlu1 %513 }
 0x135   : > { %v509_v28 = vpop.xlane.xlu0 %508 }
 0x138   : > { %v550_v47 = vpop.xlane.xlu1 %549 }
 0x139   : > { %v559_v19 = vsel %vm556_vm0, %v514_v21, %v550_v47 }
 0x13a   : > { %564 = vst.msk [vmem:[%s207_s5 + $0x10] sm:$0xff] %vm561_vm1, %v559_v19 }
 0x13d   : > { %v545_v17 = vpop.xlane.xlu0 %544  ;;  %v519_v50 = vpop.xlane.xlu2 %518 }
 0x13e   : > { %v558_v23 = vsel %vm556_vm0, %v509_v28, %v545_v17 }
 0x13f   : > { %563 = vst.msk [vmem:[%s207_s5 + $0x8] sm:$0xff] %vm561_vm1, %v558_v23 }
 0x145   : > { %v540_v13 = vpop.xlane.xlu2 %539 }
 0x146   : > { %v557_v51 = vsel %vm556_vm0, %v504_v22, %v540_v13 }
 0x147   : > { %562 = vst.msk [vmem:[%s207_s5] sm:$0xff] %vm561_vm1, %v557_v51 }
 0x14b   : > { %577 = sbr.rel (!%p841_p4) target bundleno = 336 (0x150), region = 36 }
 0x14d   : > { %v555_v24 = vpop.xlane.xlu2 %554 }
 0x14e   : > { %v560_v43 = vsel %vm556_vm0, %v519_v50, %v555_v24 }
 0x14f   : > { %565 = vst.msk [vmem:[%s207_s5 + $0x18] sm:$0xff] %vm561_vm1, %v560_v43 }
 0x150 PF: > { %p12_p9 = scmp.ge.s32.totalorder %s831_s19, 6   ;;  %s1151_s15 = smov %s781_s16 }
 0x151   : > { %s1152_s16 = smov %s839_s22  ;;  %s1153_s17 = smov %s831_s19 }
 0x152   :  { %14 = sbr.rel (!%p12_p9) target bundleno = 2 (0x2), region = 97 }

</bundles_post_ra>
